<compile_context>
chip_gen: v7x
topology: tpu7x:2x2x1
jax: 0.10.0
libtpu: 0.0.40
codegen_flags: <defaults>
</compile_context>

<pallas_src>
import functools

import jax
import jax.numpy as jnp
from jax import lax
from jax.experimental import pallas as pl
from jax.experimental.pallas import tpu as pltpu

_NEG_BIG = -1e30          # finite "-inf" for the running row max / padded cols
_LANES = 128
_ROW_ALIGN = 32           # safe sublane granularity for f32/bf16/int8 blocks
_MAX_TILE_ROWS = 256
_MAX_TILE_COLS = 2048


def _round_up(x, m):
    return ((x + m - 1) // m) * m


def _cdiv(a, b):
    return -(-a // b)


def _accumulate_tile(pred_ref, sup_ref, mask_ref,
                     m_acc, l_acc, pos_acc, npos_acc, msum_acc,
                     *, inv_temp, pad_start):
    """Fold one (tile_rows, tile_cols) column tile into the row accumulators.

    pad_start: None (no padded columns in this tile) or the static in-tile
    column index where zero padding begins.
    """
    p = pred_ref[...].astype(jnp.float32)
    m = mask_ref[...].astype(jnp.float32)
    s = sup_ref[...]                                  # native dtype, compared to 0
    tile_rows, tile_cols = p.shape

    logits = p * m * inv_temp                         # masked entries stay 0 (torch)

    n_groups = tile_cols // _LANES
    n_valid = n_groups if pad_start is None else _cdiv(pad_start, _LANES)

    def masked_group(g):
        lg = logits[:, g * _LANES:(g + 1) * _LANES]
        if pad_start is not None and (g + 1) * _LANES > pad_start:
            # Only the single straddling group pays the iota/compare/select.
            col = lax.broadcasted_iota(jnp.int32, lg.shape, 1) + g * _LANES
            lg = jnp.where(col < pad_start, lg, _NEG_BIG)
        return lg

    lgs = [masked_group(g) for g in range(n_valid)]

    # ---- pass 1: lane-wide VPU max fold, single 128-lane XLU reduce --------
    lane_max = lgs[0]
    for lg in lgs[1:]:
        lane_max = jnp.maximum(lane_max, lg)
    tile_max = jnp.max(lane_max, axis=-1, keepdims=True)     # (tile_rows, 1)

    m_old = m_acc[...]
    m_new = jnp.maximum(m_old, tile_max)
    alpha = jnp.exp(m_old - m_new)                            # (tile_rows, 1)
    m_acc[...] = m_new
    m_b = jnp.broadcast_to(m_new, (tile_rows, _LANES))        # hoisted broadcast

    # ---- pass 2: lane-wide partial sums (VPU/EUP only, no XLU) --------------
    l_new = alpha * l_acc[...]
    pos_new = pos_acc[...]
    npos_new = npos_acc[...]
    msum_new = msum_acc[...]
    for g in range(n_valid):
        lg = lgs[g]
        sg = s[:, g * _LANES:(g + 1) * _LANES]
        mg = m[:, g * _LANES:(g + 1) * _LANES]
        is_pos = (sg != 0).astype(jnp.float32)   # positive_mask = supervision.bool()
        l_new = l_new + jnp.exp(lg - m_b)        # padded cols: exp(-1e30) == 0
        pos_new = pos_new + is_pos * lg          # padded cols: 0 * (-1e30) == -0.0
        npos_new = npos_new + is_pos
        msum_new = msum_new + mg
    l_acc[...] = l_new
    pos_acc[...] = pos_new
    npos_acc[...] = npos_new
    msum_acc[...] = msum_new


def _infonce_kernel(pred_ref, sup_ref, mask_ref,
                    row_loss_ref, row_msum_ref,
                    m_acc, l_acc, pos_acc, npos_acc, msum_acc,
                    *, inv_temp, n_col_tiles, pad_start):
    j = pl.program_id(1)

    @pl.when(j == 0)
    def _init():
        m_acc[...] = jnp.full_like(m_acc, _NEG_BIG)
        l_acc[...] = jnp.zeros_like(l_acc)
        pos_acc[...] = jnp.zeros_like(pos_acc)
        npos_acc[...] = jnp.zeros_like(npos_acc)
        msum_acc[...] = jnp.zeros_like(msum_acc)

    acc = functools.partial(_accumulate_tile, pred_ref, sup_ref, mask_ref,
                            m_acc, l_acc, pos_acc, npos_acc, msum_acc,
                            inv_temp=inv_temp)

    if pad_start is not None and n_col_tiles > 1:
        # Only the last column tile contains padded columns: gate the masked
        # path to it and keep every other tile on the unmasked fast path.
        @pl.when(j == n_col_tiles - 1)
        def _last_tile():
            acc(pad_start=pad_start)

        @pl.when(j < n_col_tiles - 1)
        def _inner_tile():
            acc(pad_start=None)
    else:
        acc(pad_start=pad_start)

    @pl.when(j == n_col_tiles - 1)
    def _finalize():
        # Cross-lane reduces deferred here: once per row tile, not per byte.
        lse = (m_acc[...]
               + jnp.log(jnp.sum(l_acc[...], axis=-1, keepdims=True))
               + 1e-9)
        pos = jnp.sum(pos_acc[...], axis=-1, keepdims=True)
        npos = jnp.sum(npos_acc[...], axis=-1, keepdims=True)
        row_loss_ref[...] = jnp.where(npos > 0.0, pos - npos * lse, 0.0)
        row_msum_ref[...] = jnp.sum(msum_acc[...], axis=-1, keepdims=True)


def infonce_loss(predictions, supervision_masked, mask, temperature=0.1):
    """Pallas implementation of InfoNCELoss.forward. Returns a scalar f32.

    Inputs may be narrow dtypes (bf16 predictions, int8/bool masks) — the
    kernel upcasts to f32 internally; all accumulation is f32.
    """
    bn = predictions.shape[0]
    assert predictions.shape == (bn, bn)
    assert supervision_masked.shape == (bn, bn)
    assert mask.shape == (bn, bn)

    # --- row (parallel) tiling: guarantee >=2 row tiles when possible so the
    #     "parallel" grid axis can shard across both v7x TensorCores. ---------
    rows8 = _round_up(bn, 8)
    n_row_tiles = max(2, _cdiv(rows8, _MAX_TILE_ROWS))
    tile_rows = max(8, _round_up(_cdiv(rows8, n_row_tiles), _ROW_ALIGN))
    rows_pad = _round_up(bn, tile_rows)

    # --- column (reduction) tiling: wide tiles, minimal padding. -------------
    cols128 = _round_up(bn, _LANES)
    n_col_tiles = _cdiv(cols128, _MAX_TILE_COLS)
    tile_cols = _round_up(_cdiv(cols128, n_col_tiles), _LANES)
    cols_pad = _round_up(bn, tile_cols)
    n_col_tiles = cols_pad // tile_cols
    pad_start = None if cols_pad == bn else bn - (n_col_tiles - 1) * tile_cols

    def maybe_pad(x):
        if x.shape == (rows_pad, cols_pad):
            return x                      # no wrapper copy on aligned shapes
        return jnp.pad(x, ((0, rows_pad - bn), (0, cols_pad - bn)))

    p = maybe_pad(predictions)            # native dtype (f32 / bf16)
    s = maybe_pad(supervision_masked)     # native dtype (f32 / int8 / bool)
    m = maybe_pad(mask)                   # native dtype (f32 / int8 / bool)

    grid = (rows_pad // tile_rows, n_col_tiles)
    tile_spec = pl.BlockSpec((tile_rows, tile_cols), lambda i, j: (i, j))
    row_spec = pl.BlockSpec((tile_rows, 1), lambda i, j: (i, 0))

    n_el = rows_pad * cols_pad
    bytes_in = sum(int(x.size) * x.dtype.itemsize for x in (p, s, m))
    cost = pl.CostEstimate(
        flops=12 * n_el,
        transcendentals=n_el,
        bytes_accessed=bytes_in + 2 * rows_pad * 4,
    )

    kernel = functools.partial(
        _infonce_kernel,
        inv_temp=float(1.0 / temperature),
        n_col_tiles=n_col_tiles,
        pad_start=pad_start,
    )

    row_loss, row_msum = pl.pallas_call(
        kernel,
        out_shape=(jax.ShapeDtypeStruct((rows_pad, 1), jnp.float32),
                   jax.ShapeDtypeStruct((rows_pad, 1), jnp.float32)),
        grid_spec=pltpu.PrefetchScalarGridSpec(
            num_scalar_prefetch=0,
            grid=grid,
            in_specs=[tile_spec, tile_spec, tile_spec],
            out_specs=[row_spec, row_spec],
            scratch_shapes=[pltpu.VMEM((tile_rows, 1), jnp.float32),       # m_acc
                            pltpu.VMEM((tile_rows, _LANES), jnp.float32),  # l_acc
                            pltpu.VMEM((tile_rows, _LANES), jnp.float32),  # pos_acc
                            pltpu.VMEM((tile_rows, _LANES), jnp.float32),  # npos_acc
                            pltpu.VMEM((tile_rows, _LANES), jnp.float32)], # msum_acc
        ),
        compiler_params=pltpu.CompilerParams(
            dimension_semantics=("parallel", "arbitrary"),
            vmem_limit_bytes=32 * 1024 * 1024),
        cost_estimate=cost,
    )(p, s, m)

    loss_sum = jnp.sum(row_loss)
    mask_sum = jnp.sum(row_msum)
    denom = jnp.where(mask_sum > 0.0, mask_sum, 1.0)
    return jnp.where(mask_sum > 0.0, -loss_sum / denom, 0.0)


def infonce_loss_ref(predictions, supervision_masked, mask, temperature=0.1):
    """Pure-JAX reference matching the PyTorch InfoNCELoss module."""
    p = predictions.astype(jnp.float32)
    s = supervision_masked.astype(jnp.float32)
    m = mask.astype(jnp.float32)
    logits = p * m / temperature
    row_max = jnp.max(logits, axis=-1, keepdims=True)
    lse = (row_max[:, 0]
           + jnp.log(jnp.sum(jnp.exp(logits - row_max), axis=-1))
           + 1e-9)
    is_pos = s != 0.0
    losses = jnp.where(is_pos, logits - lse[:, None], 0.0)
    valid = m.sum()
    denom = jnp.where(valid > 0.0, valid, 1.0)
    return jnp.where(valid > 0.0, -losses.sum() / denom, 0.0)


if __name__ == "__main__":
    key = jax.random.PRNGKey(0)

    def make_case(case_key, bn, zero_mask=False):
        k1, k2, k3 = jax.random.split(case_key, 3)
        # BN x BN cosine-similarity matrix; pass bf16 predictions and int8
        # masks to the kernel (it upcasts to f32 internally).
        preds = jax.random.uniform(
            k1, (bn, bn), minval=-1.0, maxval=1.0,
            dtype=jnp.float32).astype(jnp.bfloat16)
        if zero_mask:
            msk = jnp.zeros((bn, bn), jnp.int8)
        else:
            msk = (jax.random.uniform(k3, (bn, bn)) > 0.2).astype(jnp.int8)
        perm = jax.random.permutation(k2, bn)
        sup = jnp.zeros((bn, bn), jnp.int8).at[jnp.arange(bn), perm].set(1)
        sup = sup * msk                    # "supervision_matrix_masked"
        return preds, sup, msk

    keys = jax.random.split(key, 3)
    cases = [
        make_case(keys[0], 64),                    # partial lane-group padding
        make_case(keys[1], 136),                   # row padding + 2 lane groups
        make_case(keys[2], 16, zero_mask=True),    # sum(mask) == 0 branch
    ]

    ok = True
    for preds, sup, msk in cases:
        out = jax.block_until_ready(infonce_loss(preds, sup, msk, temperature=0.1))
        ref = infonce_loss_ref(preds, sup, msk, temperature=0.1)
        ok = ok and bool(jnp.allclose(out, ref, rtol=1e-5, atol=1e-5))
        assert ok, (out, ref)

    print("KERNEL_OK")
</pallas_src>

<mosaic_0001>
module attributes {stable_mosaic.version = 11 : i64} {
  func.func @_infonce_kernel(%arg0: i32, %arg1: i32, %arg2: memref<32x128xbf16, #tpu.memory_space<vmem>>, %arg3: memref<32x128xi8, #tpu.memory_space<vmem>>, %arg4: memref<32x128xi8, #tpu.memory_space<vmem>>, %arg5: memref<32x1xf32, #tpu.memory_space<vmem>>, %arg6: memref<32x1xf32, #tpu.memory_space<vmem>>, %arg7: memref<32x1xf32, #tpu.memory_space<vmem>>, %arg8: memref<32x128xf32, #tpu.memory_space<vmem>>, %arg9: memref<32x128xf32, #tpu.memory_space<vmem>>, %arg10: memref<32x128xf32, #tpu.memory_space<vmem>>, %arg11: memref<32x128xf32, #tpu.memory_space<vmem>>) attributes {dimension_semantics = [#tpu.dimension_semantics<parallel>, #tpu.dimension_semantics<arbitrary>], iteration_bounds = array<i64: 2, 1>, scalar_prefetch = 0 : i64, scratch_operands = 5 : i64, tpu.core_type = #tpu.core_type<tc>, window_params = [{transform_indices = @transform_0, window_bounds = array<i64: 32, 128>}, {transform_indices = @transform_1, window_bounds = array<i64: 32, 128>}, {transform_indices = @transform_2, window_bounds = array<i64: 32, 128>}, {transform_indices = @transform_3, window_bounds = array<i64: 32, 1>}, {transform_indices = @transform_4, window_bounds = array<i64: 32, 1>}]} {
    %c0_i32 = arith.constant 0 : i32
    %0 = arith.cmpi eq, %arg1, %c0_i32 : i32
    %1 = arith.extui %0 : i1 to i32
    %c0_i32_0 = arith.constant 0 : i32
    %2 = arith.cmpi ne, %1, %c0_i32_0 : i32
    scf.if %2 {
      %cst_31 = arith.constant -1.000000e+30 : f32
      %51 = vector.broadcast %cst_31 : f32 to vector<32x1xf32>
      %c0_32 = arith.constant 0 : index
      %c0_33 = arith.constant 0 : index
      %52 = vector.load %arg7[%c0_32, %c0_33] : memref<32x1xf32, #tpu.memory_space<vmem>>, vector<32x1xf32>
      tpu.vector_store %arg7[%c0_32, %c0_33], %51 {strides = array<i32>} : memref<32x1xf32, #tpu.memory_space<vmem>>, vector<32x1xf32>,
      %cst_34 = arith.constant 0.000000e+00 : f32
      %53 = vector.broadcast %cst_34 : f32 to vector<32x128xf32>
      %c0_35 = arith.constant 0 : index
      %c0_36 = arith.constant 0 : index
      %54 = vector.load %arg8[%c0_35, %c0_36] : memref<32x128xf32, #tpu.memory_space<vmem>>, vector<32x128xf32>
      tpu.vector_store %arg8[%c0_35, %c0_36], %53 {strides = array<i32>} : memref<32x128xf32, #tpu.memory_space<vmem>>, vector<32x128xf32>,
      %cst_37 = arith.constant 0.000000e+00 : f32
      %55 = vector.broadcast %cst_37 : f32 to vector<32x128xf32>
      %c0_38 = arith.constant 0 : index
      %c0_39 = arith.constant 0 : index
      %56 = vector.load %arg9[%c0_38, %c0_39] : memref<32x128xf32, #tpu.memory_space<vmem>>, vector<32x128xf32>
      tpu.vector_store %arg9[%c0_38, %c0_39], %55 {strides = array<i32>} : memref<32x128xf32, #tpu.memory_space<vmem>>, vector<32x128xf32>,
      %cst_40 = arith.constant 0.000000e+00 : f32
      %57 = vector.broadcast %cst_40 : f32 to vector<32x128xf32>
      %c0_41 = arith.constant 0 : index
      %c0_42 = arith.constant 0 : index
      %58 = vector.load %arg10[%c0_41, %c0_42] : memref<32x128xf32, #tpu.memory_space<vmem>>, vector<32x128xf32>
      tpu.vector_store %arg10[%c0_41, %c0_42], %57 {strides = array<i32>} : memref<32x128xf32, #tpu.memory_space<vmem>>, vector<32x128xf32>,
      %cst_43 = arith.constant 0.000000e+00 : f32
      %59 = vector.broadcast %cst_43 : f32 to vector<32x128xf32>
      %c0_44 = arith.constant 0 : index
      %c0_45 = arith.constant 0 : index
      %60 = vector.load %arg11[%c0_44, %c0_45] : memref<32x128xf32, #tpu.memory_space<vmem>>, vector<32x128xf32>
      tpu.vector_store %arg11[%c0_44, %c0_45], %59 {strides = array<i32>} : memref<32x128xf32, #tpu.memory_space<vmem>>, vector<32x128xf32>,
    } else {
    }
    %c0 = arith.constant 0 : index
    %c0_1 = arith.constant 0 : index
    %3 = vector.load %arg2[%c0, %c0_1] : memref<32x128xbf16, #tpu.memory_space<vmem>>, vector<32x128xbf16>
    %4 = arith.extf %3 : vector<32x128xbf16> to vector<32x128xf32>
    %c0_2 = arith.constant 0 : index
    %c0_3 = arith.constant 0 : index
    %5 = vector.load %arg4[%c0_2, %c0_3] : memref<32x128xi8, #tpu.memory_space<vmem>>, vector<32x128xi8>
    %6 = arith.sitofp %5 : vector<32x128xi8> to vector<32x128xf32>
    %c0_4 = arith.constant 0 : index
    %c0_5 = arith.constant 0 : index
    %7 = vector.load %arg3[%c0_4, %c0_5] : memref<32x128xi8, #tpu.memory_space<vmem>>, vector<32x128xi8>
    %8 = arith.mulf %4, %6 : vector<32x128xf32>
    %cst = arith.constant 1.000000e+01 : f32
    %9 = vector.broadcast %cst : f32 to vector<32x128xf32>
    %10 = arith.mulf %8, %9 : vector<32x128xf32>
    %11 = tpu.iota {dimensions = array<i32: 1>} : vector<32x128xi32>
    %c0_i32_6 = arith.constant 0 : i32
    %12 = vector.broadcast %c0_i32_6 : i32 to vector<32x128xi32>
    %13 = arith.addi %11, %12 : vector<32x128xi32>
    %c64_i32 = arith.constant 64 : i32
    %14 = vector.broadcast %c64_i32 : i32 to vector<32x128xi32>
    %15 = arith.cmpi slt, %13, %14 : vector<32x128xi32>
    %cst_7 = arith.constant -1.000000e+30 : f32
    %16 = vector.broadcast %cst_7 : f32 to vector<32x128xf32>
    %17 = arith.select %15, %10, %16 : vector<32x128xi1>, vector<32x128xf32>
    %cst_8 = arith.constant dense<0xFF800000> : vector<32xf32>
    %18 = vector.multi_reduction <maximumf>, %17, %cst_8 [1] : vector<32x128xf32> to vector<32xf32>
    %19 = vector.shape_cast %18 : vector<32xf32> to vector<32x1xf32>
    %c0_9 = arith.constant 0 : index
    %c0_10 = arith.constant 0 : index
    %20 = vector.load %arg7[%c0_9, %c0_10] : memref<32x1xf32, #tpu.memory_space<vmem>>, vector<32x1xf32>
    %21 = arith.maximumf %20, %19 : vector<32x1xf32>
    %22 = arith.subf %20, %21 : vector<32x1xf32>
    %23 = math.exp %22 : vector<32x1xf32>
    %c0_11 = arith.constant 0 : index
    %c0_12 = arith.constant 0 : index
    %24 = vector.load %arg7[%c0_11, %c0_12] : memref<32x1xf32, #tpu.memory_space<vmem>>, vector<32x1xf32>
    tpu.vector_store %arg7[%c0_11, %c0_12], %21 {strides = array<i32>} : memref<32x1xf32, #tpu.memory_space<vmem>>, vector<32x1xf32>,
    %25 = vector.shape_cast %21 : vector<32x1xf32> to vector<32x1xf32>
    %26 = vector.broadcast %25 : vector<32x1xf32> to vector<32x128xf32>
    %c0_13 = arith.constant 0 : index
    %c0_14 = arith.constant 0 : index
    %27 = vector.load %arg8[%c0_13, %c0_14] : memref<32x128xf32, #tpu.memory_space<vmem>>, vector<32x128xf32>
    %28 = vector.broadcast %23 : vector<32x1xf32> to vector<32x128xf32>
    %29 = arith.mulf %28, %27 : vector<32x128xf32>
    %c0_15 = arith.constant 0 : index
    %c0_16 = arith.constant 0 : index
    %30 = vector.load %arg9[%c0_15, %c0_16] : memref<32x128xf32, #tpu.memory_space<vmem>>, vector<32x128xf32>
    %c0_17 = arith.constant 0 : index
    %c0_18 = arith.constant 0 : index
    %31 = vector.load %arg10[%c0_17, %c0_18] : memref<32x128xf32, #tpu.memory_space<vmem>>, vector<32x128xf32>
    %c0_19 = arith.constant 0 : index
    %c0_20 = arith.constant 0 : index
    %32 = vector.load %arg11[%c0_19, %c0_20] : memref<32x128xf32, #tpu.memory_space<vmem>>, vector<32x128xf32>
    %c0_i8 = arith.constant 0 : i8
    %33 = vector.broadcast %c0_i8 : i8 to vector<32x128xi8>
    %34 = arith.cmpi ne, %7, %33 : vector<32x128xi8>
    %35 = arith.extui %34 : vector<32x128xi1> to vector<32x128xi32>
    %36 = arith.sitofp %35 : vector<32x128xi32> to vector<32x128xf32>
    %37 = arith.subf %17, %26 : vector<32x128xf32>
    %38 = math.exp %37 : vector<32x128xf32>
    %39 = arith.addf %29, %38 : vector<32x128xf32>
    %40 = arith.mulf %36, %17 : vector<32x128xf32>
    %41 = arith.addf %30, %40 : vector<32x128xf32>
    %42 = arith.addf %31, %36 : vector<32x128xf32>
    %43 = arith.addf %32, %6 : vector<32x128xf32>
    %c0_21 = arith.constant 0 : index
    %c0_22 = arith.constant 0 : index
    %44 = vector.load %arg8[%c0_21, %c0_22] : memref<32x128xf32, #tpu.memory_space<vmem>>, vector<32x128xf32>
    tpu.vector_store %arg8[%c0_21, %c0_22], %39 {strides = array<i32>} : memref<32x128xf32, #tpu.memory_space<vmem>>, vector<32x128xf32>,
    %c0_23 = arith.constant 0 : index
    %c0_24 = arith.constant 0 : index
    %45 = vector.load %arg9[%c0_23, %c0_24] : memref<32x128xf32, #tpu.memory_space<vmem>>, vector<32x128xf32>
    tpu.vector_store %arg9[%c0_23, %c0_24], %41 {strides = array<i32>} : memref<32x128xf32, #tpu.memory_space<vmem>>, vector<32x128xf32>,
    %c0_25 = arith.constant 0 : index
    %c0_26 = arith.constant 0 : index
    %46 = vector.load %arg10[%c0_25, %c0_26] : memref<32x128xf32, #tpu.memory_space<vmem>>, vector<32x128xf32>
    tpu.vector_store %arg10[%c0_25, %c0_26], %42 {strides = array<i32>} : memref<32x128xf32, #tpu.memory_space<vmem>>, vector<32x128xf32>,
    %c0_27 = arith.constant 0 : index
    %c0_28 = arith.constant 0 : index
    %47 = vector.load %arg11[%c0_27, %c0_28] : memref<32x128xf32, #tpu.memory_space<vmem>>, vector<32x128xf32>
    tpu.vector_store %arg11[%c0_27, %c0_28], %43 {strides = array<i32>} : memref<32x128xf32, #tpu.memory_space<vmem>>, vector<32x128xf32>,
    %c0_i32_29 = arith.constant 0 : i32
    %48 = arith.cmpi eq, %arg1, %c0_i32_29 : i32
    %49 = arith.extui %48 : i1 to i32
    %c0_i32_30 = arith.constant 0 : i32
    %50 = arith.cmpi ne, %49, %c0_i32_30 : i32
    scf.if %50 {
      %c0_31 = arith.constant 0 : index
      %c0_32 = arith.constant 0 : index
      %51 = vector.load %arg7[%c0_31, %c0_32] : memref<32x1xf32, #tpu.memory_space<vmem>>, vector<32x1xf32>
      %c0_33 = arith.constant 0 : index
      %c0_34 = arith.constant 0 : index
      %52 = vector.load %arg8[%c0_33, %c0_34] : memref<32x128xf32, #tpu.memory_space<vmem>>, vector<32x128xf32>
      %cst_35 = arith.constant dense<0.000000e+00> : vector<32xf32>
      %53 = vector.multi_reduction <add>, %52, %cst_35 [1] : vector<32x128xf32> to vector<32xf32>
      %54 = vector.shape_cast %53 : vector<32xf32> to vector<32x1xf32>
      %55 = math.log %54 : vector<32x1xf32>
      %56 = arith.addf %51, %55 : vector<32x1xf32>
      %cst_36 = arith.constant 9.99999971E-10 : f32
      %57 = vector.broadcast %cst_36 : f32 to vector<32x1xf32>
      %58 = arith.addf %56, %57 : vector<32x1xf32>
      %c0_37 = arith.constant 0 : index
      %c0_38 = arith.constant 0 : index
      %59 = vector.load %arg9[%c0_37, %c0_38] : memref<32x128xf32, #tpu.memory_space<vmem>>, vector<32x128xf32>
      %cst_39 = arith.constant dense<0.000000e+00> : vector<32xf32>
      %60 = vector.multi_reduction <add>, %59, %cst_39 [1] : vector<32x128xf32> to vector<32xf32>
      %61 = vector.shape_cast %60 : vector<32xf32> to vector<32x1xf32>
      %c0_40 = arith.constant 0 : index
      %c0_41 = arith.constant 0 : index
      %62 = vector.load %arg10[%c0_40, %c0_41] : memref<32x128xf32, #tpu.memory_space<vmem>>, vector<32x128xf32>
      %cst_42 = arith.constant dense<0.000000e+00> : vector<32xf32>
      %63 = vector.multi_reduction <add>, %62, %cst_42 [1] : vector<32x128xf32> to vector<32xf32>
      %64 = vector.shape_cast %63 : vector<32xf32> to vector<32x1xf32>
      %cst_43 = arith.constant 0.000000e+00 : f32
      %65 = vector.broadcast %cst_43 : f32 to vector<32x1xf32>
      %66 = arith.cmpf ogt, %64, %65 : vector<32x1xf32>
      %67 = arith.mulf %64, %58 : vector<32x1xf32>
      %68 = arith.subf %61, %67 : vector<32x1xf32>
      %cst_44 = arith.constant 0.000000e+00 : f32
      %69 = vector.broadcast %cst_44 : f32 to vector<32x1xf32>
      %70 = arith.select %66, %68, %69 : vector<32x1xi1>, vector<32x1xf32>
      %c0_45 = arith.constant 0 : index
      %c0_46 = arith.constant 0 : index
      %71 = vector.load %arg5[%c0_45, %c0_46] : memref<32x1xf32, #tpu.memory_space<vmem>>, vector<32x1xf32>
      tpu.vector_store %arg5[%c0_45, %c0_46], %70 {strides = array<i32>} : memref<32x1xf32, #tpu.memory_space<vmem>>, vector<32x1xf32>,
      %c0_47 = arith.constant 0 : index
      %c0_48 = arith.constant 0 : index
      %72 = vector.load %arg11[%c0_47, %c0_48] : memref<32x128xf32, #tpu.memory_space<vmem>>, vector<32x128xf32>
      %cst_49 = arith.constant dense<0.000000e+00> : vector<32xf32>
      %73 = vector.multi_reduction <add>, %72, %cst_49 [1] : vector<32x128xf32> to vector<32xf32>
      %74 = vector.shape_cast %73 : vector<32xf32> to vector<32x1xf32>
      %c0_50 = arith.constant 0 : index
      %c0_51 = arith.constant 0 : index
      %75 = vector.load %arg6[%c0_50, %c0_51] : memref<32x1xf32, #tpu.memory_space<vmem>>, vector<32x1xf32>
      tpu.vector_store %arg6[%c0_50, %c0_51], %74 {strides = array<i32>} : memref<32x1xf32, #tpu.memory_space<vmem>>, vector<32x1xf32>,
    } else {
    }
    return
  }
  func.func @transform_0(%arg0: i32, %arg1: i32) -> (i32, i32) {
    %c0_i32 = arith.constant 0 : i32
    return %arg0, %arg1 : i32, i32
  }
  func.func @transform_1(%arg0: i32, %arg1: i32) -> (i32, i32) {
    %c0_i32 = arith.constant 0 : i32
    return %arg0, %arg1 : i32, i32
  }
  func.func @transform_2(%arg0: i32, %arg1: i32) -> (i32, i32) {
    %c0_i32 = arith.constant 0 : i32
    return %arg0, %arg1 : i32, i32
  }
  func.func @transform_3(%arg0: i32, %arg1: i32) -> (i32, i32) {
    %c0_i32 = arith.constant 0 : i32
    %c0_i32_0 = arith.constant 0 : i32
    return %arg0, %c0_i32 : i32, i32
  }
  func.func @transform_4(%arg0: i32, %arg1: i32) -> (i32, i32) {
    %c0_i32 = arith.constant 0 : i32
    %c0_i32_0 = arith.constant 0 : i32
    return %arg0, %c0_i32 : i32, i32
  }
}

</mosaic_0001>

<bundles_post_ra>
// kernel: tpu_custom_call.1
= control target key start
LH: loop header
LB: loop body
LE: loop exit
PB: predicated region body
PF: predicated region fallthrough
CT: control target
= control target key end

     0   :  { %s1407_s0 = inlined_call_operand.hbm [shape: bf16[64,128], index: 0, kind: input, shape index: {}]   ;;  %s1408_s1 = inlined_call_operand.hbm [shape: s8[64,128], index: 1, kind: input, shape index: {}]   ;;  %s1409_s2 = inlined_call_operand.hbm [shape: s8[64,128], index: 2, kind: input, shape index: {}]   ;;  %s1410_s3 = inlined_call_operand.vmem [shape: f32[64,1], index: 3, kind: output, shape index: {0}]   ;;  %s1411_s4 = inlined_call_operand.vmem [shape: f32[64,1], index: 4, kind: output, shape index: {1}]  }
   0x1   :  { %1415 = sst [smem:[#allocation14_spill]] %s1408_s1 }
   0x2   :  { %10 = vsyncpa [#allocation8], 0 }
   0x3   :  { %12 = vsyncpa [#allocation8 + $0x1], 0 }
   0x4   :  { %13 = vsyncpa [#allocation10], 0 }
   0x5   :  { %15 = vsyncpa [#allocation10 + $0x1], 0  ;;  %s1127_s15 = smov 0   ;;  %s1129_s16 = smov 0  }
   0x6   :  { %s1131_s17 = smov 0   ;;  %s1133_s18 = smov 0  }
   0x7   :  { %s1135_s19 = smov 0   ;;  %s1137_s20 = smov 0  }
   0x8 LB: > { %s1413_s21 = sadd.s32 4294967295, %s1092_s20   ;;  %s33_s22 = sadd.s32 1, %s1088_s19  ;;  %s1092_s20 = sphi %s1137_s20, %s21_s20   ;;  %s1088_s19 = sphi %s1135_s19, %s1429_s19   ;;  %s1084_s18 = sphi %s1133_s18, %s1428_s18   ;;  %s1080_s17 = sphi %s1131_s17, %s1427_s17   ;;  %s1076_s16 = sphi %s1129_s16, %s1426_s16   ;;  %s1072_s15 = sphi %s1127_s15, %s1425_s15  }
   0x9   : > { %p35_p0 = scmp.ge.s32.totalorder %s33_s22, 2  ;;  %s42_s23 = sadd.s32 1, %s1080_s17 }
   0xa   : > { %p49_p1 = scmp.ne.s32.totalorder %s1080_s17, %s1076_s16  ;;  %p50_p2 = scmp.eq.s32.totalorder %s1092_s20, 0 }
   0xb   : > { %s1431_s22 = smov (%p35_p0, %s33_s22), 0  ;;  %p55_p4 = scmp.ne.s32.totalorder %s1076_s16, %s1072_s15 }
   0xc   : > { %p51_p3 = por %p50_p2, %p49_p1  ;;  %s37_s24 = ssub.s32 %s1088_s19, %s1431_s22 }
   0xd   : > { %p56_p5 = scmp.eq.s32.totalorder %s1413_s21, 0  ;;  %p40_p6 = scmp.eq.s32.totalorder %s37_s24, 0 }
   0xe   : > { %p868_p8 = scmp.lt.s32.totalorder %s1092_s20, 2  ;;  %s1177_s27 = sand.u32 1, %s1080_s17  }
   0xf   : > { %p1168_p7 = por %p56_p5, %p55_p4  ;;  %s209_s29 = sand.u32 1, %s1092_s20  }
  0x10   : > { %s1174_s26 = scalar_select %p40_p6, %s1080_s17, %s42_s23  }
  0x11   : > { %s1416_s25 = scalar_select %p1168_p7, 1, 0 }
  0x12   : > { %p1179_p9 = pnand %p868_p8, %p51_p3  ;;  %s824_s30 = sshll.u32 %s1177_s27, 3 }
  0x13   : > { %s825_s5 = sshll.u32 %s1088_s19, 7  ;;  %s1418_s1 = sld [smem:[#allocation14_spill]] }
  0x14   : > { %s1417_s28 = scalar_select %p1179_p9, 1, 0 }
  0x15   : > { %s213_s9 = scalar_lea.vmem [#allocation9], %s824_s30  ;;  %s1197_s11 = scalar_lea.sflag [#allocation10], %s209_s29 }
  0x16   : > { %s221_s10 = sshll.u32 %s213_s9, 4  ;;  %p1203_p11 = pneg %p1179_p9  ;;  %s1195_s10 = int_to_ptr.vmem [resolvable:$true] %s221_s10 }
  0x19   : > { %s1191_s8 = scalar_lea.hbm %s1418_s1, %s825_s5  ;;  %s953_s23 = scalar_lea.hbm %s1418_s1, 256 }
  0x1a   : > { %s948_s12 = scalar_lea.hbm %s1191_s8, 128  ;;  %p954_p0 = scmp.lt.u32.totalorder %s1191_s8, %s1418_s1 }
  0x1b   : > { %p949_p10 = scmp.ne.s32.totalorder %s1191_s8, %s948_s12  ;;  %p955_p1 = scmp.lt.u32.totalorder %s953_s23, %s948_s12 }
  0x1c   : > { %p957_p3 = scmp.lt.u32.totalorder %s948_s12, %s1191_s8 }
  0x1d   : > { %p951_p12 = pnand %p1203_p11, %p949_p10  ;;  %p956_p2 = por %p955_p1, %p954_p0 }
  0x1f   : > { %p952_p13 = pneg %p951_p12  ;;  %p958_p4 = por %p957_p3, %p956_p2 }
  0x21   : > { %p959_p5 = pnand %p958_p4, %p952_p13 }
  0x23   : > { %962 = shalt.err (!%p959_p5)
}
  0x24   : > { %s963_s29 = scalar_lea.vmem %s1195_s10, 128  ;;  %s1094_s7 = smov [#allocation9]  }
  0x25   : > { %p964_p6 = scmp.ne.s32.totalorder %s1195_s10, %s963_s29  ;;  %s968_s9 = sshll.u32 %s1094_s7, 4  ;;  %s969_s9 = int_to_ptr.vmem [resolvable:$false] %s968_s9 }
  0x26   : > { %s970_s14 = scalar_lea.vmem %s969_s9, 256  ;;  %p971_p12 = scmp.lt.s32.totalorder %s1195_s10, %s969_s9 }
  0x27   : > { %p966_p8 = pnand %p964_p6, %p1203_p11  ;;  %p972_p7 = scmp.lt.s32.totalorder %s970_s14, %s963_s29 }
  0x29   : > { %p967_p10 = pneg %p966_p8  ;;  %p973_p0 = por %p972_p7, %p971_p12 }
  0x2b   : > { %p974_p1 = pnand %p973_p0, %p967_p10 }
  0x2d   : > { %977 = shalt.err (!%p974_p1)
}
  0x2e   : > { %864 = dma.hbm_to_vmem [thread:$0]  (!%p1179_p9), %s1191_s8, 128, %s1195_s10, %s1197_s11  }
  0x2f   : > { %s1232_s23 = scalar_lea.hbm %s1409_s2, %s825_s5  ;;  %p828_p7 = scmp.ge.s32.totalorder %s1092_s20, 1 }
  0x30   : > { %p245_p13 = scmp.lt.s32.totalorder %s1092_s20, 3  ;;  %s821_s6 = sshll.u32 %s1177_s27, 4 }
  0x31   : > { %s842_s29 = sshll.u32 %s1088_s19, 8  ;;  %s191_s8 = scalar_lea.vmem [#allocation7], %s821_s6 }
  0x32   : > { %p1236_p2 = pnand %p828_p7, %p245_p13  ;;  %s1245_s14 = scalar_lea.hbm %s1407_s0, %s842_s29 }
  0x33   : > { %s199_s5 = sshll.u32 %s191_s8, 4  ;;  %s1251_s10 = scalar_lea.vmem [#allocation11], %s824_s30  ;;  %s1247_s5 = int_to_ptr.vmem [resolvable:$true] %s199_s5 }
  0x34   : > { %s1420_s24 = scalar_select %p1236_p2, 1, 0 }
  0x35   : > { %s240_s12 = sshll.u32 %s1251_s10, 4  ;;  %s188_s15 = scalar_lea.sflag [#allocation8], %s1177_s27  ;;  %s241_s12 = int_to_ptr.vmem [resolvable:$true] %s240_s12 }
  0x36   : > { %s978_s21 = scalar_lea.hbm %s1245_s14, 256  ;;  %s983_s9 = scalar_lea.hbm %s1407_s0, 512 }
  0x37   : > { %p979_p3 = scmp.ne.s32.totalorder %s1245_s14, %s978_s21  ;;  %p984_p6 = scmp.lt.u32.totalorder %s1245_s14, %s1407_s0 }
  0x38   : > { %p985_p8 = scmp.lt.u32.totalorder %s983_s9, %s978_s21  ;;  %p987_p12 = scmp.lt.u32.totalorder %s978_s21, %s1245_s14 }
  0x39   : > { %p981_p4 = pnand %p979_p3, %p1203_p11 }
  0x3a   : > { %p986_p10 = por %p985_p8, %p984_p6 }
  0x3b   : > { %p982_p5 = pneg %p981_p4 }
  0x3c   : > { %p988_p0 = por %p987_p12, %p986_p10 }
  0x3e   : > { %p989_p1 = pnand %p988_p0, %p982_p5 }
  0x40   : > { %992 = shalt.err (!%p989_p1)
}
  0x41   : > { %s993_s30 = scalar_lea.vmem %s1247_s5, 256  ;;  %s1095_s8 = smov [#allocation7]  }
  0x42   : > { %p994_p7 = scmp.ne.s32.totalorder %s1247_s5, %s993_s30  ;;  %s998_s29 = sshll.u32 %s1095_s8, 4  ;;  %s999_s29 = int_to_ptr.vmem [resolvable:$false] %s998_s29 }
  0x43   : > { %s1000_s1 = scalar_lea.vmem %s999_s29, 512  ;;  %p1001_p4 = scmp.lt.s32.totalorder %s1247_s5, %s999_s29 }
  0x44   : > { %p996_p13 = pnand %p994_p7, %p1203_p11  ;;  %p1002_p2 = scmp.lt.s32.totalorder %s1000_s1, %s993_s30 }
  0x46   : > { %p997_p3 = pneg %p996_p13  ;;  %p1003_p6 = por %p1002_p2, %p1001_p4 }
  0x48   : > { %p1004_p8 = pnand %p1003_p6, %p997_p3 }
  0x4a   : > { %1007 = shalt.err (!%p1004_p8)
}
  0x4b   : > { %s1096_s21 = smov 64   ;;  %s1097_s7 = smov 4  }
  0x4c   : > { %861 = dma.hbm_to_vmem [thread:$0]  (!%p1179_p9), %s1245_s14, 256, %s1247_s5, %s188_s15, %s1096_s21, %s1096_s21, %s1097_s7  }
  0x4d   : > { %s1008_s9 = scalar_lea.hbm %s1232_s23, 128  ;;  %s1013_s8 = scalar_lea.hbm %s1409_s2, 256 }
  0x4e   : > { %p1009_p2 = scmp.ne.s32.totalorder %s1232_s23, %s1008_s9  ;;  %p1014_p12 = scmp.lt.u32.totalorder %s1232_s23, %s1409_s2 }
  0x4f   : > { %p1015_p0 = scmp.lt.u32.totalorder %s1013_s8, %s1008_s9  ;;  %p1017_p7 = scmp.lt.u32.totalorder %s1008_s9, %s1232_s23 }
  0x50   : > { %p1011_p5 = pnand %p1009_p2, %p1203_p11 }
  0x51   : > { %p1016_p1 = por %p1015_p0, %p1014_p12 }
  0x52   : > { %p1012_p10 = pneg %p1011_p5 }
  0x53   : > { %p1018_p13 = por %p1017_p7, %p1016_p1 }
  0x55   : > { %p1019_p3 = pnand %p1018_p13, %p1012_p10 }
  0x57   : > { %1022 = shalt.err (!%p1019_p3)
}
  0x58   : > { %s1023_s27 = scalar_lea.vmem %s241_s12, 128  ;;  %s1098_s14 = smov [#allocation11]  }
  0x59   : > { %p1024_p4 = scmp.ne.s32.totalorder %s241_s12, %s1023_s27  ;;  %s1028_s5 = sshll.u32 %s1098_s14, 4  ;;  %s1029_s5 = int_to_ptr.vmem [resolvable:$false] %s1028_s5 }
  0x5a   : > { %s1030_s10 = scalar_lea.vmem %s1029_s5, 256  ;;  %p1031_p2 = scmp.lt.s32.totalorder %s241_s12, %s1029_s5 }
  0x5b   : > { %p1026_p6 = pnand %p1024_p4, %p1203_p11  ;;  %p1032_p5 = scmp.lt.s32.totalorder %s1030_s10, %s1023_s27 }
  0x5d   : > { %p1027_p8 = pneg %p1026_p6  ;;  %p1033_p9 = por %p1032_p5, %p1031_p2 }
  0x5f   : > { %p1034_p0 = pnand %p1033_p9, %p1027_p8 }
  0x61   : > { %1037 = shalt.err (!%p1034_p0)
}
  0x62   : > { %p1421_p12 = scmp.ne.s32.totalorder %s1417_s28, 0  ;;  %p1422_p10 = scmp.ne.s32.totalorder %s1420_s24, 0 }
  0x63   : > { %s251_s13 = sand.u32 (!%p1422_p10), 1, %s1076_s16   ;;  %p1423_p11 = scmp.ne.s32.totalorder (!%p1422_p10), %s1416_s25, 0 }
  0x64   : > { %867 = dma.hbm_to_vmem [thread:$0]  (!%p1421_p12), %s1232_s23, 128, %s241_s12, %s1197_s11  }
  0x65   : > { %249 = sbr.rel (%p1422_p10) target bundleno = 595 (0x253), region = 32  ;;  %s829_s15 = sshll.u32 (!%p1422_p10), %s251_s13, 4 }
  0x66   : > { %s252_s21 = scalar_lea.sflag (!%p1422_p10), [#allocation8], %s251_s13  ;;  %s255_s7 = scalar_lea.vmem (!%p1422_p10), [#allocation7], %s829_s15 }
  0x6c   : > { %1063 = dma.done.wait (%p1423_p11), %s252_s21, 256  }
  0x6d   : > { %1065 = vsyncadd (%p1423_p11), %s252_s21, 4294967040  ;;  %s1424_s9 = sadd.s32 4294967295, %s1092_s20   ;;  %s830_s6 = sshll.u32 %s251_s13, 3 }
  0x6e   : > { %s260_s28 = sand.u32 1, %s1424_s9   ;;  %s1307_s23 = scalar_lea.vmem [#allocation9], %s830_s6 }
  0x6f   : > { %s261_s11 = scalar_lea.sflag [#allocation10], %s260_s28 }
  0x70   : > { %1067 = dma.done.wait (%p1423_p11), %s261_s11, 256  }
  0x71   : > { %1069 = vsyncadd (%p1423_p11), %s261_s11, 4294967040  ;;  %vm332_vm0 = vcmask 7168   ;;  %v1099_v0 = vmov -1e+30   ;;  %v379_v1 = vlaneseq  ;;  %v844_v2 = vld [vmem:[%s255_s7] sm:$0xff]   ;;  %s273_s24 = scalar_lea.vmem [#allocation11], %s830_s6 }
  0x72   : > { %333 = vst.msk [vmem:[#allocation2] sm:$0xff] %vm332_vm0, %v1099_v0  ;;  %334 = vst.msk [vmem:[#allocation2 + $0x8] sm:$0xff] %vm332_vm0, %v1099_v0  ;;  %v361_v3 = vld [vmem:[%s273_s24] sm:$0xff]  ;;  %v845_v6 = vunpack.c.l.bf16 %v844_v2  ;;  %v846_v8 = vunpack.c.h.bf16 %v844_v2  ;;  %v1100_v30 = vmov 0   ;;  %v370_v55 = vld [vmem:[%s1307_s23] sm:$0xff]  ;;  %s832_s25 = sshll.u32 %s1084_s18, 2 }
  0x73   : > { %335 = vst.msk [vmem:[#allocation2 + $0x10] sm:$0xff] %vm332_vm0, %v1099_v0  ;;  %336 = vst.msk [vmem:[#allocation2 + $0x18] sm:$0xff] %vm332_vm0, %v1099_v0  ;;  %v380_v4 = vand.u32 127, %v379_v1  ;;  %v851_v5 = vld [vmem:[%s255_s7 + $0x8] sm:$0xff]   ;;  %v362_v7 = vunpack.c.0.s8 %v361_v3  ;;  %v363_v9 = vunpack.c.1.s8 %v361_v3  ;;  %v364_v11 = vunpack.c.2.s8 %v361_v3  ;;  %922 = vset.pattern.permute.xlu0 %v1100_v30  ;;  %923 = vset.pattern.permute.xlu1 %v1100_v30  ;;  %p315_p9 = scmp.lt.s32.totalorder %s832_s25, 7 }
  0x74   : > { %v849_v10 = vunpack.c.l.bf16 %v851_v5  ;;  %v850_v12 = vunpack.c.h.bf16 %v851_v5  ;;  %v365_v13 = vunpack.c.3.s8 %v361_v3  ;;  %vm479_vm2 = vnez %v370_v55 }
  0x75   : > { %v1317_v14 = vcvt.s32.f32 %v362_v7  ;;  %v1319_v15 = vcvt.s32.f32 %v363_v9  ;;  %v1321_v16 = vcvt.s32.f32 %v364_v11  ;;  %vm381_vm1 = vcmp.lt.s32.totalorder %v380_v4, 64  ;;  %s1433_s25 = smov (!%p315_p9, %s832_s25), 7 }
  0x76   : > { %v1323_v17 = vcvt.s32.f32 %v365_v13  ;;  %v480_v58 = vsel %vm479_vm2, 16843009, %v1100_v30  ;;  %s833_s18 = sshll.u32 %s1433_s25, 3 }
  0x77   : > { %v371_v18 = vmul.f32 %v845_v6, %v1317_v14  ;;  %v372_v19 = vmul.f32 %v846_v8, %v1319_v15  ;;  %v373_v20 = vmul.f32 %v849_v10, %v1321_v16  ;;  %v481_v62 = vunpack.c.0.s8 %v480_v58  ;;  %s1372_s8 = scalar_lea.vmem %s1410_s3, %s833_s18  ;;  %s324_s27 = scalar_lea.vmem %s1411_s4, %s833_s18 }
  0x78   : > { %v374_v21 = vmul.f32 %v850_v12, %v1323_v17  ;;  %v482_v1 = vunpack.c.1.s8 %v480_v58  ;;  %v483_v9 = vunpack.c.2.s8 %v480_v58 }
  0x79   : > { %v375_v22 = vmul.f32 10.0, %v371_v18  ;;  %v376_v23 = vmul.f32 10.0, %v372_v19  ;;  %v377_v24 = vmul.f32 10.0, %v373_v20  ;;  %v394_v31 = vld [vmem:[#allocation2] sm:$0xff]  ;;  %v395_v36 = vld [vmem:[#allocation2 + $0x8] sm:$0xff]  ;;  %v485_v3 = vpack.c.b16 %v481_v62, %v481_v62 }
  0x7a   : > { %v378_v25 = vmul.f32 10.0, %v374_v21  ;;  %v396_v32 = vld [vmem:[#allocation2 + $0x10] sm:$0xff]  ;;  %v397_v39 = vld [vmem:[#allocation2 + $0x18] sm:$0xff]  ;;  %v487_v6 = vpack.c.b16 %v482_v1, %v482_v1  ;;  %v489_v18 = vpack.c.b16 %v483_v9, %v483_v9  ;;  %v484_v19 = vunpack.c.3.s8 %v480_v58 }
  0x7b   : > { %v1329_v26 = vsel %vm381_vm1, %v375_v22, -1e+30  ;;  %v1332_v27 = vsel %vm381_vm1, %v377_v24, -1e+30  ;;  %v1334_v28 = vsel %vm381_vm1, %v376_v23, -1e+30  ;;  %v486_v8 = vpack.c.b8 %v485_v3, %v485_v3 }
  0x7c   : > { %386 = vmax.xlane.f32.xlu0 %v1329_v26  ;;  %390 = vmax.xlane.f32.xlu1 %v1332_v27  ;;  %v1337_v29 = vsel %vm381_vm1, %v378_v25, -1e+30  ;;  %v488_v12 = vpack.c.b8 %v487_v6, %v487_v6  ;;  %v490_v25 = vpack.c.b8 %v489_v18, %v489_v18 }
  0x7d   : > { %vm493_vm3 = vnez %v486_v8 }
  0x7e   : > { %v497_v23 = vsel %vm493_vm3, 16843009, %v1100_v30  ;;  %vm494_vm4 = vnez %v488_v12  ;;  %vm495_vm5 = vnez %v490_v25 }
  0x80   : > { %388 = vmax.xlane.f32.xlu0 %v1334_v28  ;;  %392 = vmax.xlane.f32.xlu1 %v1337_v29 }
 0x109   : > { %v387_v33 = vpop.xlane.xlu0 %386  ;;  %v391_v35 = vpop.xlane.xlu1 %390 }
 0x10a   : > { %v398_v34 = vmax.f32 %v394_v31, %v387_v33  ;;  %v400_v37 = vmax.f32 %v396_v32, %v391_v35 }
 0x10c   : > { %v402_v38 = vsub.f32 %v394_v31, %v398_v34  ;;  %415 = vst.msk [vmem:[#allocation2] sm:$0xff] %vm332_vm0, %v398_v34  ;;  %421 = vperm.xlu0 %922, %v398_v34   ;;  %417 = vst.msk [vmem:[#allocation2 + $0x10] sm:$0xff] %vm332_vm0, %v400_v37  ;;  %v404_v44 = vsub.f32 %v396_v32, %v400_v37  ;;  %v491_v31 = vpack.c.b16 %v484_v19, %v484_v19 }
 0x10d   : > { %v389_v40 = vpop.xlane.xlu0 %388  ;;  %v393_v43 = vpop.xlane.xlu1 %392  ;;  %v501_v34 = vunpack.c.0.s8 %v497_v23 }
 0x10e   : > { %v406_v41 = vmul.f32 1.442695, %v402_v38  ;;  %v399_v42 = vmax.f32 %v395_v36, %v389_v40  ;;  %v401_v45 = vmax.f32 %v397_v39, %v393_v43  ;;  %v410_v48 = vmul.f32 1.442695, %v404_v44 }
 0x10f   : > { %v492_v38 = vpack.c.b8 %v491_v31, %v491_v31  ;;  %vm505_vm6 = vcmp.ne.s32.totalorder %v501_v34, 0  ;;  %v499_v43 = vsel %vm495_vm5, 16843009, %v1100_v30 }
 0x110   : > { %924 = vpow2.f32 %v406_v41  ;;  %v403_v46 = vsub.f32 %v395_v36, %v399_v42  ;;  %416 = vst.msk [vmem:[#allocation2 + $0x8] sm:$0xff] %vm332_vm0, %v399_v42  ;;  %426 = vperm.xlu1 %923, %v399_v42   ;;  %418 = vst.msk [vmem:[#allocation2 + $0x18] sm:$0xff] %vm332_vm0, %v401_v45  ;;  %v405_v49 = vsub.f32 %v397_v39, %v401_v45  ;;  %v498_v36 = vsel %vm494_vm4, 16843009, %v1100_v30 }
 0x111   : > { %v502_v41 = vunpack.c.0.s8 %v498_v36  ;;  %vm496_vm7 = vnez %v492_v38 }
 0x112   : > { %v408_v47 = vmul.f32 1.442695, %v403_v46  ;;  %v412_v50 = vmul.f32 1.442695, %v405_v49  ;;  %v1101_v46 = vmov 0.0   ;;  %v503_v49 = vunpack.c.0.s8 %v499_v43 }
 0x113   : > { %vm506_vm8 = vcmp.ne.s32.totalorder %v502_v41, 0  ;;  %v570_v9 = vld [vmem:[#allocation2 + $0x10] sm:$0xff] }
 0x114   : > { %926 = vpow2.f32 %v408_v47  ;;  %431 = vperm.xlu1 %923, %v400_v37   ;;  %v836_v47 = vsel %vm505_vm6, 1.0, %v1101_v46  ;;  %vm507_vm9 = vcmp.ne.s32.totalorder %v503_v49, 0 }
 0x115   : > { %928 = vpow2.f32 %v410_v48  ;;  %v838_v55 = vsel %vm507_vm9, 1.0, %v1101_v46 }
 0x116   : > { %930 = vpow2.f32 %v412_v50  ;;  %v500_v50 = vsel %vm496_vm7, 16843009, %v1100_v30 }
 0x117   : > { %v571_v23 = vld [vmem:[#allocation2 + $0x18] sm:$0xff] }
 0x118   : > { %436 = vperm.xlu1 %923, %v401_v45  }
 0x11a   : > { %v925_v51 = vpop.eup %924 }
 0x11c   : > { %445 = vperm.xlu1 %923, %v925_v51   ;;  %v533_v51 = vmul.f32 %v836_v47, %v1329_v26 }
 0x11e   : > { %v927_v52 = vpop.eup %926 }
 0x11f   : > { %v929_v53 = vpop.eup %928 }
 0x120   : > { %450 = vperm.xlu1 %923, %v927_v52   ;;  %v931_v54 = vpop.eup %930  ;;  %v837_v52 = vsel %vm506_vm8, 1.0, %v1101_v46 }
 0x124   : > { %455 = vperm.xlu1 %923, %v929_v53   ;;  %v504_v53 = vunpack.c.0.s8 %v500_v50 }
 0x126   : > { %vm508_vm10 = vcmp.ne.s32.totalorder %v504_v53, 0 }
 0x128   : > { %460 = vperm.xlu1 %923, %v931_v54   ;;  %v534_v54 = vmul.f32 %v837_v52, %v1334_v28 }
 0x18b   : > { %v422_v56 = vpop.permute.xlu0 %421 }
 0x18c   : > { %v517_v57 = vsub.f32 %v1329_v26, %v422_v56  ;;  %v535_v56 = vmul.f32 %v838_v55, %v1332_v27 }
 0x18e   : > { %v521_v59 = vmul.f32 1.442695, %v517_v57  ;;  %v839_v57 = vsel %vm508_vm10, 1.0, %v1101_v46 }
 0x18f   : > { %v427_v60 = vpop.permute.xlu1 %426  ;;  %v536_v30 = vmul.f32 %v839_v57, %v1337_v29 }
 0x190   : > { %v518_v61 = vsub.f32 %v1334_v28, %v427_v60  ;;  %932 = vpow2.f32 %v521_v59 }
 0x192   : > { %v523_v63 = vmul.f32 1.442695, %v518_v61 }
 0x193   : > { %v432_v0 = vpop.permute.xlu1 %431 }
 0x194   : > { %v519_v2 = vsub.f32 %v1332_v27, %v432_v0  ;;  %934 = vpow2.f32 %v523_v63  ;;  %v569_v0 = vld [vmem:[#allocation2 + $0x8] sm:$0xff] }
 0x196   : > { %v525_v4 = vmul.f32 1.442695, %v519_v2 }
 0x197   : > { %v437_v5 = vpop.permute.xlu1 %436 }
 0x198   : > { %v520_v7 = vsub.f32 %v1337_v29, %v437_v5  ;;  %936 = vpow2.f32 %v525_v4 }
 0x19a   : > { %v527_v10 = vmul.f32 1.442695, %v520_v7  ;;  %v933_v20 = vpop.eup %932 }
 0x19b   : > { %v446_v11 = vpop.permute.xlu1 %445 }
 0x19c   : > { %v463_v13 = vmul.f32 0.0, %v446_v11  ;;  %938 = vpow2.f32 %v527_v10 }
 0x19e   : > { %v529_v21 = vadd.f32 %v933_v20, %v463_v13  ;;  %v935_v32 = vpop.eup %934 }
 0x19f   : > { %v451_v22 = vpop.permute.xlu1 %450 }
 0x1a0   : > { %v464_v24 = vmul.f32 0.0, %v451_v22  ;;  %576 = vadd.xlane.f32.xlu1 %v529_v21 }
 0x1a2   : > { %v530_v33 = vadd.f32 %v935_v32, %v464_v24  ;;  %v937_v39 = vpop.eup %936 }
 0x1a3   : > { %v456_v35 = vpop.permute.xlu1 %455 }
 0x1a4   : > { %v465_v37 = vmul.f32 0.0, %v456_v35  ;;  %578 = vadd.xlane.f32.xlu0 %v530_v33 }
 0x1a6   : > { %v531_v40 = vadd.f32 %v937_v39, %v465_v37  ;;  %v939_v45 = vpop.eup %938 }
 0x1a7   : > { %v461_v42 = vpop.permute.xlu1 %460 }
 0x1a8   : > { %v466_v44 = vmul.f32 0.0, %v461_v42  ;;  %580 = vadd.xlane.f32.xlu0 %v531_v40 }
 0x1aa   : > { %v532_v48 = vadd.f32 %v939_v45, %v466_v44 }
 0x1ac   : > { %582 = vadd.xlane.f32.xlu1 %v532_v48  ;;  %616 = vadd.xlane.f32.xlu0 %v836_v47 }
 0x1b0   : > { %618 = vadd.xlane.f32.xlu1 %v837_v52  ;;  %604 = vadd.xlane.f32.xlu0 %v533_v51 }
 0x1b4   : > { %620 = vadd.xlane.f32.xlu1 %v838_v55  ;;  %606 = vadd.xlane.f32.xlu0 %v534_v54 }
 0x1b8   : > { %622 = vadd.xlane.f32.xlu1 %v839_v57  ;;  %608 = vadd.xlane.f32.xlu0 %v535_v56 }
 0x1bc   : > { %610 = vadd.xlane.f32.xlu1 %v536_v30  ;;  %648 = vadd.xlane.f32.xlu0 %v1317_v14  ;;  %v568_v14 = vld [vmem:[#allocation2] sm:$0xff] }
 0x1c0   : > { %650 = vadd.xlane.f32.xlu1 %v1319_v15  ;;  %652 = vadd.xlane.f32.xlu0 %v1321_v16 }
 0x1c4   : > { %654 = vadd.xlane.f32.xlu1 %v1323_v17 }
 0x22d   : > { %v577_v26 = vpop.xlane.xlu1 %576 }
 0x22e   : > { %940 = vlog2.f32 %v577_v26 }
 0x231   : > { %v579_v28 = vpop.xlane.xlu0 %578 }
 0x232   : > { %942 = vlog2.f32 %v579_v28 }
 0x235   : > { %v581_v27 = vpop.xlane.xlu0 %580 }
 0x236   : > { %944 = vlog2.f32 %v581_v27 }
 0x238   : > { %v941_v58 = vpop.eup %940 }
 0x239   : > { %v585_v59 = vmul.f32 0.6931472, %v941_v58  ;;  %v583_v29 = vpop.xlane.xlu1 %582  ;;  %v617_v60 = vpop.xlane.xlu0 %616 }
 0x23a   : > { %946 = vlog2.f32 %v583_v29  ;;  %vm624_vm11 = vcmp.gt.f32.partialorder %v617_v60, 0.0 }
 0x23b   : > { %v592_v15 = vadd.f32 %v585_v59, %v568_v14 }
 0x23c   : > { %v943_v16 = vpop.eup %942 }
 0x23d   : > { %v587_v17 = vmul.f32 0.6931472, %v943_v16  ;;  %v596_v61 = vadd.f32 1e-09, %v592_v15  ;;  %v619_v62 = vpop.xlane.xlu1 %618  ;;  %v605_v63 = vpop.xlane.xlu0 %604 }
 0x23e   : > { %vm625_vm12 = vcmp.gt.f32.partialorder %v619_v62, 0.0 }
 0x23f   : > { %v628_v1 = vmul.f32 %v617_v60, %v596_v61  ;;  %v593_v2 = vadd.f32 %v587_v17, %v569_v0 }
 0x240   : > { %v945_v3 = vpop.eup %944 }
 0x241   : > { %v589_v4 = vmul.f32 0.6931472, %v945_v3  ;;  %v597_v5 = vadd.f32 1e-09, %v593_v2  ;;  %v632_v6 = vsub.f32 %v605_v63, %v628_v1  ;;  %v621_v7 = vpop.xlane.xlu1 %620  ;;  %v607_v8 = vpop.xlane.xlu0 %606 }
 0x242   : > { %vm626_vm13 = vcmp.gt.f32.partialorder %v621_v7, 0.0 }
 0x243   : > { %v629_v10 = vmul.f32 %v619_v62, %v597_v5  ;;  %v636_v11 = vsel %vm624_vm11, %v632_v6, 0.0  ;;  %v594_v12 = vadd.f32 %v589_v4, %v570_v9 }
 0x244   : > { %v947_v13 = vpop.eup %946  ;;  %640 = vst.msk [vmem:[%s1372_s8] sm:$0xff] %vm332_vm0, %v636_v11 }
 0x245   : > { %v591_v18 = vmul.f32 0.6931472, %v947_v13  ;;  %v598_v19 = vadd.f32 1e-09, %v594_v12  ;;  %v633_v20 = vsub.f32 %v607_v8, %v629_v10  ;;  %v623_v21 = vpop.xlane.xlu1 %622  ;;  %v609_v22 = vpop.xlane.xlu0 %608 }
 0x246   : > { %vm627_vm14 = vcmp.gt.f32.partialorder %v623_v21, 0.0 }
 0x247   : > { %v630_v24 = vmul.f32 %v621_v7, %v598_v19  ;;  %v637_v25 = vsel %vm625_vm12, %v633_v20, 0.0  ;;  %v595_v31 = vadd.f32 %v591_v18, %v571_v23 }
 0x248   : > { %641 = vst.msk [vmem:[%s1372_s8 + $0x8] sm:$0xff] %vm332_vm0, %v637_v25 }
 0x249   : > { %v599_v32 = vadd.f32 1e-09, %v595_v31  ;;  %v634_v33 = vsub.f32 %v609_v22, %v630_v24  ;;  %v611_v34 = vpop.xlane.xlu1 %610  ;;  %v649_v35 = vpop.xlane.xlu0 %648 }
 0x24a   : > { %656 = vst.msk [vmem:[%s324_s27] sm:$0xff] %vm332_vm0, %v649_v35 }
 0x24b   : > { %v631_v36 = vmul.f32 %v623_v21, %v599_v32  ;;  %v638_v37 = vsel %vm626_vm13, %v634_v33, 0.0 }
 0x24c   : > { %642 = vst.msk [vmem:[%s1372_s8 + $0x10] sm:$0xff] %vm332_vm0, %v638_v37 }
 0x24d   : > { %v635_v38 = vsub.f32 %v611_v34, %v631_v36  ;;  %v651_v39 = vpop.xlane.xlu1 %650  ;;  %v653_v40 = vpop.xlane.xlu0 %652 }
 0x24e   : > { %657 = vst.msk [vmem:[%s324_s27 + $0x8] sm:$0xff] %vm332_vm0, %v651_v39  ;;  %658 = vst.msk [vmem:[%s324_s27 + $0x10] sm:$0xff] %vm332_vm0, %v653_v40 }
 0x24f   : > { %v639_v41 = vsel %vm627_vm14, %v635_v38, 0.0 }
 0x250   : > { %643 = vst.msk [vmem:[%s1372_s8 + $0x18] sm:$0xff] %vm332_vm0, %v639_v41 }
 0x251   : > { %v655_v42 = vpop.xlane.xlu1 %654 }
 0x252   : > { %659 = vst.msk [vmem:[%s324_s27 + $0x18] sm:$0xff] %vm332_vm0, %v655_v42 }
 0x253 PF: > { %s21_s20 = sadd.s32 1, %s1092_s20   ;;  %s1425_s15 = smov %s1076_s16 }
 0x254   : > { %p18_p1 = scmp.ge.s32.totalorder %s21_s20, 4   ;;  %s1426_s16 = smov %s1080_s17 }
 0x255   : > { %s1427_s17 = smov %s1174_s26  ;;  %s1428_s18 = smov %s1088_s19 }
 0x256   : > { %s1429_s19 = smov %s1431_s22  ;;  %20 = sbr.rel (!%p18_p1) target bundleno = 8 (0x8), region = 116 }
 0x25d   :  { %699 = vsyncpa [#allocation8], 1 }
 0x25e   :  { %701 = vsyncpa [#allocation8 + $0x1], 1 }
 0x25f   :  { %702 = vsyncpa [#allocation10], 1 }
 0x260   :  { %704 = vsyncpa [#allocation10 + $0x1], 1 }

</bundles_post_ra>
